<compile_context>
chip_gen: v7x
topology: tpu7x:2x2x1
jax: 0.10.0
libtpu: 0.0.40
codegen_flags: <defaults>
</compile_context>

<pallas_src>
import functools

import jax
import jax.numpy as jnp
from jax import lax
from jax.experimental import pallas as pl
from jax.experimental.pallas import tpu as pltpu

ALPHA = 2  # hard-coded as squares in the kernel (module defaults)
BETA = 4
LANES = 128


def _focal_kernel(n_ref, pred_ref, targ_ref, out_ref):
    """One row-tile of the flattened heatmap.

    n_ref    : (1,) SMEM scalar-prefetch, true (unpadded) element count
    pred_ref : (TM, 128) VMEM tile
    targ_ref : (TM, 128) VMEM tile
    out_ref  : (3, 128) VMEM output block for this grid step
               rows = [lane-wise pos_loss sum, lane-wise neg_loss sum, lane-wise pos count]
    """
    i = pl.program_id(0)

    p = pred_ref[...].astype(jnp.float32)
    t = targ_ref[...].astype(jnp.float32)
    tm, lanes = p.shape

    # Validity mask over flattened element index (handles reshape padding and
    # Pallas partial-block garbage rows alike).
    row_iota = lax.broadcasted_iota(jnp.int32, (tm, lanes), 0)
    lane_iota = lax.broadcasted_iota(jnp.int32, (tm, lanes), 1)
    gidx = (i * tm + row_iota) * lanes + lane_iota
    valid = gidx < n_ref[0]

    pos_mask = jnp.logical_and(t == 1.0, valid)
    neg_mask = jnp.logical_and(t < 1.0, valid)

    one_minus_p = 1.0 - p
    one_minus_t = 1.0 - t

    # negative_weights = (1 - target)^beta, beta = 4
    neg_w = one_minus_t * one_minus_t
    neg_w = neg_w * neg_w

    # positive_loss = log(p) * (1 - p)^alpha  where target == 1      (alpha = 2)
    pos_loss = jnp.where(pos_mask, jnp.log(p) * (one_minus_p * one_minus_p), 0.0)
    # negative_loss = log(1 - p) * p^alpha * neg_w  where target < 1
    neg_loss = jnp.where(neg_mask, jnp.log(one_minus_p) * (p * p) * neg_w, 0.0)
    pos_cnt = jnp.where(pos_mask, 1.0, 0.0)

    # Reduce only over the row (sublane) axis here; keep lanes for the wrapper
    # to reduce (cheaper per-step critical path, better summation accuracy).
    out_ref[0:1, :] = jnp.sum(pos_loss, axis=0, keepdims=True)
    out_ref[1:2, :] = jnp.sum(neg_loss, axis=0, keepdims=True)
    out_ref[2:3, :] = jnp.sum(pos_cnt, axis=0, keepdims=True)


@functools.partial(jax.jit, static_argnames=("tm",))
def focal_loss(prediction, target, *, tm=2048):
    """Pallas implementation of FocalLoss(alpha=2, beta=4).forward."""
    assert prediction.shape == target.shape
    pred = prediction.reshape(-1)
    targ = target.reshape(-1)
    n = pred.shape[0]

    # Minimal pad so the flat vector reshapes to (rows, 128). Values are
    # irrelevant: the kernel masks by the true count n. For numel % 128 == 0
    # (the common case) this is a free reshape — no HBM copy.
    pad = (-n) % LANES
    if pad:
        pred = jnp.concatenate([pred, jnp.full((pad,), 0.5, pred.dtype)])
        targ = jnp.concatenate([targ, jnp.full((pad,), 0.0, targ.dtype)])

    rows = pred.shape[0] // LANES
    pred2d = pred.reshape(rows, LANES)
    targ2d = targ.reshape(rows, LANES)

    # Tile: as large as possible but no larger than the array; keep sublane
    # count aligned when it is a strict sub-block.
    tm_eff = min(tm, rows)
    if tm_eff < rows and tm_eff % 8 != 0:
        tm_eff = max(8, (tm_eff // 8) * 8)
    num_blocks = pl.cdiv(rows, tm_eff)

    n_arr = jnp.asarray([n], dtype=jnp.int32)

    partials = pl.pallas_call(
        _focal_kernel,
        out_shape=jax.ShapeDtypeStruct((num_blocks, 3, LANES), jnp.float32),
        grid_spec=pltpu.PrefetchScalarGridSpec(
            num_scalar_prefetch=1,
            grid=(num_blocks,),
            in_specs=[
                pl.BlockSpec((tm_eff, LANES), lambda i, n_ref: (i, 0)),
                pl.BlockSpec((tm_eff, LANES), lambda i, n_ref: (i, 0)),
            ],
            out_specs=pl.BlockSpec((None, 3, LANES), lambda i, n_ref: (i, 0, 0)),
        ),
        compiler_params=pltpu.CompilerParams(
            # Per-block independent outputs -> parallel grid axis (megacore on v7x).
            dimension_semantics=("parallel",),
        ),
    )(n_arr, pred2d, targ2d)

    sums = jnp.sum(partials, axis=(0, 2))  # (3,) : [pos_sum, neg_sum, num_pos]
    pos_sum, neg_sum, num_pos = sums[0], sums[1], sums[2]
    # if num_positive == 0: loss = -negative_loss else -(pos + neg) / num_positive
    return -jnp.where(num_pos == 0.0, neg_sum, (pos_sum + neg_sum) / num_pos)


def focal_loss_ref(prediction, target):
    """Pure-JAX reference matching the PyTorch module exactly."""
    p = prediction.astype(jnp.float32)
    t = target.astype(jnp.float32)
    pos_idx = (t == 1.0).astype(jnp.float32)
    neg_idx = (t < 1.0).astype(jnp.float32)
    neg_w = jnp.power(1.0 - t, BETA)
    pos_loss = jnp.log(p) * jnp.power(1.0 - p, ALPHA) * pos_idx
    neg_loss = jnp.log(1.0 - p) * jnp.power(p, ALPHA) * neg_w * neg_idx
    num_pos = pos_idx.sum()
    pos_sum = pos_loss.sum()
    neg_sum = neg_loss.sum()
    return -jnp.where(num_pos == 0.0, neg_sum, (pos_sum + neg_sum) / num_pos)


if __name__ == "__main__":
    key = jax.random.PRNGKey(0)
    k1, k2, k3 = jax.random.split(key, 3)

    N, C, H, W = 2, 4, 16, 16  # NCHW heatmaps

    # prediction in (0, 1) via sigmoid
    prediction = jax.nn.sigmoid(jax.random.normal(k1, (N, C, H, W), jnp.float32))
    # target heatmap in [0, 1), with a few exact 1.0 "positive" peaks
    target = jax.random.uniform(k2, (N, C, H, W), jnp.float32, 0.0, 0.999)
    peak_rows = jax.random.randint(k3, (N, C), 0, H)
    target = target.at[jnp.arange(N)[:, None], jnp.arange(C)[None, :], peak_rows, 5].set(1.0)

    out = focal_loss(prediction, target)
    out = jax.block_until_ready(out)

    ref = focal_loss_ref(prediction, target)
    assert jnp.allclose(out, ref, rtol=1e-5, atol=1e-5), (out, ref)
    print("KERNEL_OK")
</pallas_src>

<mosaic_0001>
module attributes {stable_mosaic.version = 11 : i64} {
  func.func @_focal_kernel(%arg0: i32, %arg1: memref<1xi32, #tpu.memory_space<smem>>, %arg2: memref<16x128xf32, #tpu.memory_space<vmem>>, %arg3: memref<16x128xf32, #tpu.memory_space<vmem>>, %arg4: memref<1x3x128xf32, #tpu.memory_space<vmem>>) attributes {dimension_semantics = [#tpu.dimension_semantics<parallel>], iteration_bounds = array<i64: 1>, scalar_prefetch = 1 : i64, scratch_operands = 0 : i64, tpu.core_type = #tpu.core_type<tc>, window_params = [{transform_indices = @transform_0, window_bounds = array<i64: 16, 128>}, {transform_indices = @transform_1, window_bounds = array<i64: 16, 128>}, {transform_indices = @transform_2, window_bounds = array<i64: 1, 3, 128>}]} {
    %c0 = arith.constant 0 : index
    %c0_0 = arith.constant 0 : index
    %0 = vector.load %arg2[%c0, %c0_0] : memref<16x128xf32, #tpu.memory_space<vmem>>, vector<16x128xf32>
    %c0_1 = arith.constant 0 : index
    %c0_2 = arith.constant 0 : index
    %1 = vector.load %arg3[%c0_1, %c0_2] : memref<16x128xf32, #tpu.memory_space<vmem>>, vector<16x128xf32>
    %2 = tpu.iota {dimensions = array<i32: 0>} : vector<16x128xi32>
    %3 = tpu.iota {dimensions = array<i32: 1>} : vector<16x128xi32>
    %c16_i32 = arith.constant 16 : i32
    %4 = arith.muli %arg0, %c16_i32 : i32
    %5 = vector.broadcast %4 : i32 to vector<16x128xi32>
    %6 = arith.addi %5, %2 : vector<16x128xi32>
    %c128_i32 = arith.constant 128 : i32
    %7 = vector.broadcast %c128_i32 : i32 to vector<16x128xi32>
    %8 = arith.muli %6, %7 : vector<16x128xi32>
    %9 = arith.addi %8, %3 : vector<16x128xi32>
    %c0_3 = arith.constant 0 : index
    %10 = memref.load %arg1[%c0_3] : memref<1xi32, #tpu.memory_space<smem>>
    %11 = vector.broadcast %10 : i32 to vector<16x128xi32>
    %12 = arith.cmpi slt, %9, %11 : vector<16x128xi32>
    %cst = arith.constant 1.000000e+00 : f32
    %13 = vector.broadcast %cst : f32 to vector<16x128xf32>
    %14 = arith.cmpf oeq, %1, %13 : vector<16x128xf32>
    %15 = arith.andi %14, %12 : vector<16x128xi1>
    %cst_4 = arith.constant 1.000000e+00 : f32
    %16 = vector.broadcast %cst_4 : f32 to vector<16x128xf32>
    %17 = arith.cmpf olt, %1, %16 : vector<16x128xf32>
    %18 = arith.andi %17, %12 : vector<16x128xi1>
    %cst_5 = arith.constant 1.000000e+00 : f32
    %19 = vector.broadcast %cst_5 : f32 to vector<16x128xf32>
    %20 = arith.subf %19, %0 : vector<16x128xf32>
    %cst_6 = arith.constant 1.000000e+00 : f32
    %21 = vector.broadcast %cst_6 : f32 to vector<16x128xf32>
    %22 = arith.subf %21, %1 : vector<16x128xf32>
    %23 = arith.mulf %22, %22 : vector<16x128xf32>
    %24 = arith.mulf %23, %23 : vector<16x128xf32>
    %25 = math.log %0 : vector<16x128xf32>
    %26 = arith.mulf %20, %20 : vector<16x128xf32>
    %27 = arith.mulf %25, %26 : vector<16x128xf32>
    %cst_7 = arith.constant 0.000000e+00 : f32
    %28 = vector.broadcast %cst_7 : f32 to vector<16x128xf32>
    %29 = arith.select %15, %27, %28 : vector<16x128xi1>, vector<16x128xf32>
    %30 = math.log %20 : vector<16x128xf32>
    %31 = arith.mulf %0, %0 : vector<16x128xf32>
    %32 = arith.mulf %30, %31 : vector<16x128xf32>
    %33 = arith.mulf %32, %24 : vector<16x128xf32>
    %cst_8 = arith.constant 0.000000e+00 : f32
    %34 = vector.broadcast %cst_8 : f32 to vector<16x128xf32>
    %35 = arith.select %18, %33, %34 : vector<16x128xi1>, vector<16x128xf32>
    %cst_9 = arith.constant 1.000000e+00 : f32
    %cst_10 = arith.constant 0.000000e+00 : f32
    %36 = vector.broadcast %cst_9 : f32 to vector<16x128xf32>
    %37 = vector.broadcast %cst_10 : f32 to vector<16x128xf32>
    %38 = arith.select %15, %36, %37 : vector<16x128xi1>, vector<16x128xf32>
    %cst_11 = arith.constant dense<0.000000e+00> : vector<128xf32>
    %39 = vector.multi_reduction <add>, %29, %cst_11 [0] : vector<16x128xf32> to vector<128xf32>
    %40 = vector.shape_cast %39 : vector<128xf32> to vector<1x128xf32>
    %c0_12 = arith.constant 0 : index
    %c0_13 = arith.constant 0 : index
    %c0_14 = arith.constant 0 : index
    %41 = vector.load %arg4[%c0_12, %c0_13, %c0_14] : memref<1x3x128xf32, #tpu.memory_space<vmem>>, vector<1x1x128xf32>
    %42 = vector.shape_cast %41 : vector<1x1x128xf32> to vector<1x128xf32>
    %43 = vector.shape_cast %40 : vector<1x128xf32> to vector<1x1x128xf32>
    tpu.vector_store %arg4[%c0_12, %c0_13, %c0_14], %43 {strides = array<i32>} : memref<1x3x128xf32, #tpu.memory_space<vmem>>, vector<1x1x128xf32>,
    %cst_15 = arith.constant dense<0.000000e+00> : vector<128xf32>
    %44 = vector.multi_reduction <add>, %35, %cst_15 [0] : vector<16x128xf32> to vector<128xf32>
    %45 = vector.shape_cast %44 : vector<128xf32> to vector<1x128xf32>
    %c0_16 = arith.constant 0 : index
    %c1 = arith.constant 1 : index
    %c0_17 = arith.constant 0 : index
    %46 = vector.load %arg4[%c0_16, %c1, %c0_17] : memref<1x3x128xf32, #tpu.memory_space<vmem>>, vector<1x1x128xf32>
    %47 = vector.shape_cast %46 : vector<1x1x128xf32> to vector<1x128xf32>
    %48 = vector.shape_cast %45 : vector<1x128xf32> to vector<1x1x128xf32>
    tpu.vector_store %arg4[%c0_16, %c1, %c0_17], %48 {strides = array<i32>} : memref<1x3x128xf32, #tpu.memory_space<vmem>>, vector<1x1x128xf32>,
    %cst_18 = arith.constant dense<0.000000e+00> : vector<128xf32>
    %49 = vector.multi_reduction <add>, %38, %cst_18 [0] : vector<16x128xf32> to vector<128xf32>
    %50 = vector.shape_cast %49 : vector<128xf32> to vector<1x128xf32>
    %c0_19 = arith.constant 0 : index
    %c2 = arith.constant 2 : index
    %c0_20 = arith.constant 0 : index
    %51 = vector.load %arg4[%c0_19, %c2, %c0_20] : memref<1x3x128xf32, #tpu.memory_space<vmem>>, vector<1x1x128xf32>
    %52 = vector.shape_cast %51 : vector<1x1x128xf32> to vector<1x128xf32>
    %53 = vector.shape_cast %50 : vector<1x128xf32> to vector<1x1x128xf32>
    tpu.vector_store %arg4[%c0_19, %c2, %c0_20], %53 {strides = array<i32>} : memref<1x3x128xf32, #tpu.memory_space<vmem>>, vector<1x1x128xf32>,
    return
  }
  func.func @transform_0(%arg0: i32, %arg1: memref<1xi32, #tpu.memory_space<smem>>) -> (i32, i32) {
    %c0_i32 = arith.constant 0 : i32
    %c0_i32_0 = arith.constant 0 : i32
    return %arg0, %c0_i32 : i32, i32
  }
  func.func @transform_1(%arg0: i32, %arg1: memref<1xi32, #tpu.memory_space<smem>>) -> (i32, i32) {
    %c0_i32 = arith.constant 0 : i32
    %c0_i32_0 = arith.constant 0 : i32
    return %arg0, %c0_i32 : i32, i32
  }
  func.func @transform_2(%arg0: i32, %arg1: memref<1xi32, #tpu.memory_space<smem>>) -> (i32, i32, i32) {
    %c0_i32 = arith.constant 0 : i32
    %c0_i32_0 = arith.constant 0 : i32
    %c0_i32_1 = arith.constant 0 : i32
    return %arg0, %c0_i32, %c0_i32_0 : i32, i32, i32
  }
}

</mosaic_0001>

<bundles_post_ra>
// kernel: focal_loss.1
= control target key start
LH: loop header
LB: loop body
LE: loop exit
PB: predicated region body
PF: predicated region fallthrough
CT: control target
= control target key end

     0   :  { %v17_v0 = vlaneseq  ;;  %v111_v20 = vmov 0.0   ;;  %s189_s1 = inlined_call_operand.vmem [shape: f32[16,128], index: 1, kind: input, shape index: {}]   ;;  %s190_s0 = inlined_call_operand.<no memory space> [shape: s32[1], index: 0, kind: input, shape index: {}]   ;;  %s191_s2 = inlined_call_operand.vmem [shape: f32[16,128], index: 2, kind: input, shape index: {}]   ;;  %s192_s3 = inlined_call_operand.vmem [shape: f32[1,3,128], index: 3, kind: output, shape index: {}]  }
   0x1   :  { %v13_v1 = vld [vmem:[%s189_s1] sm:$0xff]  ;;  %v14_v2 = vld [vmem:[%s189_s1 + $0x8] sm:$0xff]  ;;  %v31_v10 = vstv %s190_s0 }
   0x2   :  { %v18_v3 = vshrl.u32 %v17_v0, 7  ;;  %v21_v4 = vand.u32 127, %v17_v0  ;;  %v42_v5 = vsub.f32 1.0, %v13_v1  ;;  %v43_v6 = vsub.f32 1.0, %v14_v2  ;;  %v15_v9 = vld [vmem:[%s191_s2] sm:$0xff]  ;;  %v16_v11 = vld [vmem:[%s191_s2 + $0x8] sm:$0xff] }
   0x3   :  { %103 = vlog2.f32 %v13_v1  ;;  %vm34_vm0 = vcmp.eq.f32.partialorder %v15_v9, 1.0  ;;  %vm35_vm2 = vcmp.eq.f32.partialorder %v16_v11, 1.0  ;;  %v44_v16 = vsub.f32 1.0, %v15_v9 }
   0x4   :  { %v19_v7 = vadd.s32 8, %v18_v3  ;;  %v26_v8 = vmul.u32 128, %v18_v3  ;;  %105 = vlog2.f32 %v14_v2  ;;  %v45_v18 = vsub.f32 1.0, %v16_v11 }
   0x5   :  { %107 = vlog2.f32 %v42_v5  ;;  %v54_v23 = vmul.f32 %v42_v5, %v42_v5  ;;  %v46_v24 = vmul.f32 %v44_v16, %v44_v16  ;;  %v55_v27 = vmul.f32 %v43_v6, %v43_v6 }
   0x6   :  { %v27_v12 = vmul.u32 128, %v19_v7  ;;  %v28_v13 = vadd.s32 %v26_v8, %v21_v4  ;;  %109 = vlog2.f32 %v43_v6  ;;  %v47_v28 = vmul.f32 %v45_v18, %v45_v18 }
   0x7   :  { %v64_v32 = vmul.f32 %v13_v1, %v13_v1  ;;  %vm38_vm6 = vcmp.lt.f32.partialorder %v15_v9, 1.0  ;;  %v65_v35 = vmul.f32 %v14_v2, %v14_v2  ;;  %vm39_vm7 = vcmp.lt.f32.partialorder %v16_v11, 1.0 }
   0x8   :  { %v29_v14 = vadd.s32 %v27_v12, %v21_v4  ;;  %vm147_vm1 = vcmp.lt.s32.totalorder %v28_v13, %v31_v10  ;;  %v48_v39 = vmul.f32 %v46_v24, %v46_v24  ;;  %v49_v42 = vmul.f32 %v47_v28, %v47_v28 }
   0x9   :  { %vm153_vm3 = vmand %vm34_vm0, %vm147_vm1 }
   0xa   :  { %vm157_vm4 = vcmp.lt.s32.totalorder %v29_v14, %v31_v10  ;;  %v72_v21 = vsel %vm153_vm3, 1.0, %v111_v20  ;;  %vm40_vm8 = vmand %vm38_vm6, %vm147_vm1 }
   0xb   :  { %vm165_vm5 = vmand %vm35_vm2, %vm157_vm4 }
   0xc   :  { %v73_v25 = vsel %vm165_vm5, 1.0, %v111_v20  ;;  %vm41_vm9 = vmand %vm39_vm7, %vm157_vm4 }
   0xd   :  { %v104_v26 = vpop.eup %103  ;;  %v90_v29 = vadd.f32 %v73_v25, %v72_v21 }
   0xe   :  { %v106_v30 = vpop.eup %105  ;;  %v51_v31 = vmul.f32 0.6931472, %v104_v26 }
   0xf   :  { %v108_v33 = vpop.eup %107  ;;  %v53_v34 = vmul.f32 0.6931472, %v106_v30  ;;  %v91_v36 = vrot.slane %v90_v29, 4 }
  0x10   :  { %v110_v37 = vpop.eup %109  ;;  %v56_v38 = vmul.f32 %v54_v23, %v51_v31  ;;  %v61_v40 = vmul.f32 0.6931472, %v108_v33 }
  0x11   :  { %v57_v41 = vmul.f32 %v55_v27, %v53_v34  ;;  %v63_v43 = vmul.f32 0.6931472, %v110_v37  ;;  %v92_v44 = vadd.f32 %v91_v36, %v90_v29 }
  0x12   :  { %v58_v45 = vsel %vm153_vm3, %v56_v38, 0.0  ;;  %v66_v46 = vmul.f32 %v64_v32, %v61_v40 }
  0x13   :  { %v59_v47 = vsel %vm165_vm5, %v57_v41, 0.0  ;;  %v67_v48 = vmul.f32 %v65_v35, %v63_v43  ;;  %v93_v49 = vrot.slane %v92_v44, 2 }
  0x14   :  { %v74_v50 = vadd.f32 %v59_v47, %v58_v45  ;;  %v68_v51 = vmul.f32 %v66_v46, %v48_v39 }
  0x15   :  { %v69_v52 = vmul.f32 %v67_v48, %v49_v42  ;;  %v94_v53 = vadd.f32 %v93_v49, %v92_v44 }
  0x16   :  { %v75_v54 = vrot.slane %v74_v50, 4  ;;  %v70_v55 = vsel %vm40_vm8, %v68_v51, 0.0 }
  0x17   :  { %v71_v56 = vsel %vm41_vm9, %v69_v52, 0.0  ;;  %v95_v57 = vrot.slane %v94_v53, 1 }
  0x18   :  { %v76_v58 = vadd.f32 %v75_v54, %v74_v50  ;;  %v82_v59 = vadd.f32 %v71_v56, %v70_v55 }
  0x19   :  { %v96_v60 = vadd.f32 %v95_v57, %v94_v53 }
  0x1a   :  { %v77_v61 = vrot.slane %v76_v58, 2  ;;  %v83_v62 = vrot.slane %v82_v59, 4 }
  0x1b   :  { %97 = vst [vmem:[%s192_s3 + $0x2] sm:$0x1] %v96_v60 }
  0x1c   :  { %v78_v63 = vadd.f32 %v77_v61, %v76_v58  ;;  %v84_v0 = vadd.f32 %v83_v62, %v82_v59 }
  0x1e   :  { %v79_v1 = vrot.slane %v78_v63, 1  ;;  %v85_v2 = vrot.slane %v84_v0, 2 }
  0x20   :  { %v80_v3 = vadd.f32 %v79_v1, %v78_v63  ;;  %v86_v4 = vadd.f32 %v85_v2, %v84_v0 }
  0x22   :  { %81 = vst [vmem:[%s192_s3] sm:$0x1] %v80_v3  ;;  %v87_v5 = vrot.slane %v86_v4, 1 }
  0x24   :  { %v88_v6 = vadd.f32 %v87_v5, %v86_v4 }
  0x26   :  { %89 = vst [vmem:[%s192_s3 + $0x1] sm:$0x1] %v88_v6 }

</bundles_post_ra>
